<compile_context>
chip_gen: v7x
topology: tpu7x:2x2x1
jax: 0.10.0
libtpu: 0.0.40
codegen_flags: <defaults>
</compile_context>

<pallas_src>
import math

import jax
import jax.numpy as jnp
from jax.experimental import pallas as pl
from jax.experimental.pallas import tpu as pltpu

# ----- model dims (synthetic, consistent with train_dqn.py) ------------------
NUM_PLAYERS = 4
MIN_CARD_NUM = 3
MAX_CARD_NUM = 8
N_OBSERVATIONS = NUM_PLAYERS + MAX_CARD_NUM - MIN_CARD_NUM + 3  # = 12
N_ACTIONS = 2
HIDDEN = 128

MXU_DTYPE = jnp.bfloat16  # MXU-input dtype; accumulation & elementwise stay f32


def _round_up(n, m):
    return ((n + m - 1) // m) * m


def _pick_tile_b(batch):
    """Batch rows per grid step.

    <= 256 rows: a single tile (rounded up to sublane granularity).
    >  256 rows: fill the 256-row MXU M dim (v6e/v7x) but keep >= 2 tiles so
    the "parallel" batch axis can shard across v7x's two TensorCores. On v5e
    (4x128^2 MXU) 256 rows simply halves per-step overhead.
    """
    if batch <= 8:
        return batch  # block == full array; tiny demo batches
    if batch <= 256:
        return min(256, _round_up(batch, 8))
    return min(512, _round_up(pl.cdiv(batch, 2), 128))


def dqn_kernel(x_ref, w1_ref, b1_ref, w2_ref, b2_ref, w3_ref, b3_ref, o_ref):
    """Fused 3-layer MLP forward for one (TILE_B, 12) batch tile.

    Weights/biases are full-array blocks resident in VMEM across all grid
    steps (constant index_map). Matmuls run on the MXU with bf16 inputs and
    f32 accumulation; bias add + ReLU stay in f32 on the VPU. The output
    block is the natural (TILE_B, 2) — a narrow masked store, but 64x fewer
    HBM bytes than a 128-lane padded writeback.
    """
    x = x_ref[...].astype(MXU_DTYPE)
    h1 = jnp.dot(x, w1_ref[...], preferred_element_type=jnp.float32) + b1_ref[...]
    h1 = jnp.maximum(h1, 0.0)
    h2 = jnp.dot(h1.astype(MXU_DTYPE), w2_ref[...],
                 preferred_element_type=jnp.float32) + b2_ref[...]
    h2 = jnp.maximum(h2, 0.0)
    out = jnp.dot(h2.astype(MXU_DTYPE), w3_ref[...],
                  preferred_element_type=jnp.float32) + b3_ref[...]
    o_ref[...] = out.astype(o_ref.dtype)


@jax.jit
def dqn_forward(x, kernel_params):
    """Fused DQN forward. x: (batch, N_OBSERVATIONS) f32 -> (batch, N_ACTIONS) f32."""
    w1, b1, w2, b2, w3, b3 = kernel_params
    batch, feat = x.shape

    tile_b = _pick_tile_b(batch)
    num_tiles = pl.cdiv(batch, tile_b)  # partial last block is fine (rows independent)

    resident = lambda a: pl.BlockSpec(a.shape, lambda i: (0, 0))

    flops = 2 * batch * (feat * HIDDEN + HIDDEN * HIDDEN + HIDDEN * N_ACTIONS)
    bytes_accessed = (
        x.size * x.dtype.itemsize
        + sum(a.size * a.dtype.itemsize for a in kernel_params)
        + batch * N_ACTIONS * 4
    )

    return pl.pallas_call(
        dqn_kernel,
        out_shape=jax.ShapeDtypeStruct((batch, N_ACTIONS), jnp.float32),
        grid=(num_tiles,),
        in_specs=[
            pl.BlockSpec((tile_b, feat), lambda i: (i, 0)),  # x: streamed per tile
            resident(w1), resident(b1),
            resident(w2), resident(b2),
            resident(w3), resident(b3),
        ],
        out_specs=pl.BlockSpec((tile_b, N_ACTIONS), lambda i: (i, 0)),
        compiler_params=pltpu.CompilerParams(
            dimension_semantics=("parallel",),  # v7x: batch tiles across both TCs
        ),
        cost_estimate=pl.CostEstimate(
            flops=flops, transcendentals=0, bytes_accessed=bytes_accessed),
    )(x, w1, b1, w2, b2, w3, b3)


def init_linear(key, fan_in, fan_out):
    """torch.nn.Linear-style init (uniform +-1/sqrt(fan_in)); W as (in, out)."""
    kw, kb = jax.random.split(key)
    bound = 1.0 / math.sqrt(fan_in)
    w = jax.random.uniform(kw, (fan_in, fan_out), jnp.float32, -bound, bound)
    b = jax.random.uniform(kb, (1, fan_out), jnp.float32, -bound, bound)
    return w, b


def prepare_params(params):
    """One-time prep: weights -> bf16 for the MXU; biases stay f32."""
    w1, b1, w2, b2, w3, b3 = params
    return (w1.astype(MXU_DTYPE), b1,
            w2.astype(MXU_DTYPE), b2,
            w3.astype(MXU_DTYPE), b3)


def reference_forward_f32(x, params):
    w1, b1, w2, b2, w3, b3 = params
    h1 = jnp.maximum(x @ w1 + b1, 0.0)
    h2 = jnp.maximum(h1 @ w2 + b2, 0.0)
    return h2 @ w3 + b3


def reference_forward_bf16(x, params):
    """Same numerics as the kernel: bf16 MXU inputs, f32 accumulation/elementwise."""
    w1, b1, w2, b2, w3, b3 = params
    dot = lambda a, w: jnp.dot(a.astype(MXU_DTYPE), w.astype(MXU_DTYPE),
                               preferred_element_type=jnp.float32)
    h1 = jnp.maximum(dot(x, w1) + b1, 0.0)
    h2 = jnp.maximum(dot(h1, w2) + b2, 0.0)
    return dot(h2, w3) + b3


if __name__ == "__main__":
    root = jax.random.PRNGKey(0)
    kx, k1, k2, k3 = jax.random.split(root, 4)

    batch = 300  # not a tile multiple: exercises the partial-last-block path
    x = jax.random.normal(kx, (batch, N_OBSERVATIONS), jnp.float32)

    w1, b1 = init_linear(k1, N_OBSERVATIONS, HIDDEN)
    w2, b2 = init_linear(k2, HIDDEN, HIDDEN)
    w3, b3 = init_linear(k3, HIDDEN, N_ACTIONS)
    params = (w1, b1, w2, b2, w3, b3)
    kernel_params = prepare_params(params)

    out = jax.block_until_ready(dqn_forward(x, kernel_params))
    assert out.shape == (batch, N_ACTIONS), out.shape

    # Tight check vs a reference with identical bf16-input / f32-accumulation numerics.
    ref_bf16 = reference_forward_bf16(x, params)
    assert jnp.allclose(out, ref_bf16, atol=1e-2, rtol=1e-2), "mismatch vs bf16 reference"

    # Loose sanity check vs the pure-f32 PyTorch-equivalent forward.
    ref_f32 = reference_forward_f32(x, params)
    assert jnp.allclose(out, ref_f32, atol=1e-1, rtol=1e-1), "mismatch vs f32 reference"

    print("KERNEL_OK")
</pallas_src>

<mosaic_0001>
module attributes {stable_mosaic.version = 11 : i64} {
  func.func @dqn_kernel(%arg0: i32, %arg1: memref<256x12xf32, #tpu.memory_space<vmem>>, %arg2: memref<12x128xbf16, #tpu.memory_space<vmem>>, %arg3: memref<1x128xf32, #tpu.memory_space<vmem>>, %arg4: memref<128x128xbf16, #tpu.memory_space<vmem>>, %arg5: memref<1x128xf32, #tpu.memory_space<vmem>>, %arg6: memref<128x2xbf16, #tpu.memory_space<vmem>>, %arg7: memref<1x2xf32, #tpu.memory_space<vmem>>, %arg8: memref<256x2xf32, #tpu.memory_space<vmem>>) attributes {dimension_semantics = [#tpu.dimension_semantics<parallel>], iteration_bounds = array<i64: 2>, scalar_prefetch = 0 : i64, scratch_operands = 0 : i64, tpu.core_type = #tpu.core_type<tc>, window_params = [{transform_indices = @transform_0, window_bounds = array<i64: 256, 12>}, {pipeline_mode = #tpu.pipeline_mode<synchronous>, transform_indices = @transform_1, window_bounds = array<i64: 12, 128>}, {pipeline_mode = #tpu.pipeline_mode<synchronous>, transform_indices = @transform_2, window_bounds = array<i64: 1, 128>}, {pipeline_mode = #tpu.pipeline_mode<synchronous>, transform_indices = @transform_3, window_bounds = array<i64: 128, 128>}, {pipeline_mode = #tpu.pipeline_mode<synchronous>, transform_indices = @transform_4, window_bounds = array<i64: 1, 128>}, {pipeline_mode = #tpu.pipeline_mode<synchronous>, transform_indices = @transform_5, window_bounds = array<i64: 128, 2>}, {pipeline_mode = #tpu.pipeline_mode<synchronous>, transform_indices = @transform_6, window_bounds = array<i64: 1, 2>}, {transform_indices = @transform_7, window_bounds = array<i64: 256, 2>}]} {
    %c0 = arith.constant 0 : index
    %c0_0 = arith.constant 0 : index
    %0 = vector.load %arg1[%c0, %c0_0] : memref<256x12xf32, #tpu.memory_space<vmem>>, vector<256x12xf32>
    %1 = arith.truncf %0 : vector<256x12xf32> to vector<256x12xbf16>
    %c0_1 = arith.constant 0 : index
    %c0_2 = arith.constant 0 : index
    %2 = vector.load %arg2[%c0_1, %c0_2] : memref<12x128xbf16, #tpu.memory_space<vmem>>, vector<12x128xbf16>
    %cst = arith.constant dense<0.000000e+00> : vector<256x128xf32>
    %3 = tpu.matmul %1, %2, %cst {dimension_numbers = #tpu.dot_dimension_numbers<[1], [0], [0], [1], [0, 0, 1, 1], [], []>} : vector<256x12xbf16>, vector<12x128xbf16>, vector<256x128xf32> -> vector<256x128xf32>
    %c0_3 = arith.constant 0 : index
    %c0_4 = arith.constant 0 : index
    %4 = vector.load %arg3[%c0_3, %c0_4] : memref<1x128xf32, #tpu.memory_space<vmem>>, vector<1x128xf32>
    %5 = vector.broadcast %4 : vector<1x128xf32> to vector<256x128xf32>
    %6 = arith.addf %3, %5 : vector<256x128xf32>
    %cst_5 = arith.constant 0.000000e+00 : f32
    %7 = vector.broadcast %cst_5 : f32 to vector<256x128xf32>
    %8 = arith.maximumf %6, %7 : vector<256x128xf32>
    %9 = arith.truncf %8 : vector<256x128xf32> to vector<256x128xbf16>
    %c0_6 = arith.constant 0 : index
    %c0_7 = arith.constant 0 : index
    %10 = vector.load %arg4[%c0_6, %c0_7] : memref<128x128xbf16, #tpu.memory_space<vmem>>, vector<128x128xbf16>
    %cst_8 = arith.constant dense<0.000000e+00> : vector<256x128xf32>
    %11 = tpu.matmul %9, %10, %cst_8 {dimension_numbers = #tpu.dot_dimension_numbers<[1], [0], [0], [1], [0, 0, 1, 1], [], []>} : vector<256x128xbf16>, vector<128x128xbf16>, vector<256x128xf32> -> vector<256x128xf32>
    %c0_9 = arith.constant 0 : index
    %c0_10 = arith.constant 0 : index
    %12 = vector.load %arg5[%c0_9, %c0_10] : memref<1x128xf32, #tpu.memory_space<vmem>>, vector<1x128xf32>
    %13 = vector.broadcast %12 : vector<1x128xf32> to vector<256x128xf32>
    %14 = arith.addf %11, %13 : vector<256x128xf32>
    %cst_11 = arith.constant 0.000000e+00 : f32
    %15 = vector.broadcast %cst_11 : f32 to vector<256x128xf32>
    %16 = arith.maximumf %14, %15 : vector<256x128xf32>
    %17 = arith.truncf %16 : vector<256x128xf32> to vector<256x128xbf16>
    %c0_12 = arith.constant 0 : index
    %c0_13 = arith.constant 0 : index
    %18 = vector.load %arg6[%c0_12, %c0_13] : memref<128x2xbf16, #tpu.memory_space<vmem>>, vector<128x2xbf16>
    %cst_14 = arith.constant dense<0.000000e+00> : vector<256x2xf32>
    %19 = tpu.matmul %17, %18, %cst_14 {dimension_numbers = #tpu.dot_dimension_numbers<[1], [0], [0], [1], [0, 0, 1, 1], [], []>} : vector<256x128xbf16>, vector<128x2xbf16>, vector<256x2xf32> -> vector<256x2xf32>
    %c0_15 = arith.constant 0 : index
    %c0_16 = arith.constant 0 : index
    %20 = vector.load %arg7[%c0_15, %c0_16] : memref<1x2xf32, #tpu.memory_space<vmem>>, vector<1x2xf32>
    %21 = vector.broadcast %20 : vector<1x2xf32> to vector<256x2xf32>
    %22 = arith.addf %19, %21 : vector<256x2xf32>
    %c0_17 = arith.constant 0 : index
    %c0_18 = arith.constant 0 : index
    %23 = vector.load %arg8[%c0_17, %c0_18] : memref<256x2xf32, #tpu.memory_space<vmem>>, vector<256x2xf32>
    tpu.vector_store %arg8[%c0_17, %c0_18], %22 {strides = array<i32>} : memref<256x2xf32, #tpu.memory_space<vmem>>, vector<256x2xf32>,
    return
  }
  func.func @transform_0(%arg0: i32) -> (i32, i32) {
    %c0_i32 = arith.constant 0 : i32
    %c0_i32_0 = arith.constant 0 : i32
    return %arg0, %c0_i32 : i32, i32
  }
  func.func @transform_1(%arg0: i32) -> (i32, i32) {
    %c0_i32 = arith.constant 0 : i32
    %c0_i32_0 = arith.constant 0 : i32
    %c0_i32_1 = arith.constant 0 : i32
    return %c0_i32, %c0_i32_0 : i32, i32
  }
  func.func @transform_2(%arg0: i32) -> (i32, i32) {
    %c0_i32 = arith.constant 0 : i32
    %c0_i32_0 = arith.constant 0 : i32
    %c0_i32_1 = arith.constant 0 : i32
    return %c0_i32, %c0_i32_0 : i32, i32
  }
  func.func @transform_3(%arg0: i32) -> (i32, i32) {
    %c0_i32 = arith.constant 0 : i32
    %c0_i32_0 = arith.constant 0 : i32
    %c0_i32_1 = arith.constant 0 : i32
    return %c0_i32, %c0_i32_0 : i32, i32
  }
  func.func @transform_4(%arg0: i32) -> (i32, i32) {
    %c0_i32 = arith.constant 0 : i32
    %c0_i32_0 = arith.constant 0 : i32
    %c0_i32_1 = arith.constant 0 : i32
    return %c0_i32, %c0_i32_0 : i32, i32
  }
  func.func @transform_5(%arg0: i32) -> (i32, i32) {
    %c0_i32 = arith.constant 0 : i32
    %c0_i32_0 = arith.constant 0 : i32
    %c0_i32_1 = arith.constant 0 : i32
    return %c0_i32, %c0_i32_0 : i32, i32
  }
  func.func @transform_6(%arg0: i32) -> (i32, i32) {
    %c0_i32 = arith.constant 0 : i32
    %c0_i32_0 = arith.constant 0 : i32
    %c0_i32_1 = arith.constant 0 : i32
    return %c0_i32, %c0_i32_0 : i32, i32
  }
  func.func @transform_7(%arg0: i32) -> (i32, i32) {
    %c0_i32 = arith.constant 0 : i32
    %c0_i32_0 = arith.constant 0 : i32
    return %arg0, %c0_i32 : i32, i32
  }
}

</mosaic_0001>

<bundles_post_ra>
// kernel: dqn_forward.1
= control target key start
LH: loop header
LB: loop body
LE: loop exit
PB: predicated region body
PF: predicated region fallthrough
CT: control target
= control target key end

     0   :  { %s2004_s24 = smov 0   ;;  %s2006_s25 = smov 0   ;;  %s2465_s0 = inlined_call_operand.vmem [shape: f32[300,12], index: 0, kind: input, shape index: {}]   ;;  %s2466_s1 = inlined_call_operand.vmem [shape: bf16[12,128], index: 1, kind: input, shape index: {}]   ;;  %s2467_s2 = inlined_call_operand.vmem [shape: f32[1,128], index: 2, kind: input, shape index: {}]   ;;  %s2468_s3 = inlined_call_operand.vmem [shape: bf16[128,128], index: 3, kind: input, shape index: {}]   ;;  %s2469_s4 = inlined_call_operand.vmem [shape: f32[1,128], index: 4, kind: input, shape index: {}]   ;;  %s2470_s5 = inlined_call_operand.vmem [shape: bf16[128,2], index: 5, kind: input, shape index: {}]   ;;  %s2471_s6 = inlined_call_operand.vmem [shape: f32[1,2], index: 6, kind: input, shape index: {}]   ;;  %s2472_s7 = inlined_call_operand.vmem [shape: f32[300,2], index: 7, kind: output, shape index: {}]  }
   0x1   :  { %s2008_s26 = smov 0  }
   0x2 LB: > { %s2017_s27 = sadd.s32 4294967295, %s1930_s26   ;;  %s2019_s28 = sadd.s32 1, %s1930_s26   ;;  %s1930_s26 = sphi %s2008_s26, %s2481_s26   ;;  %s1926_s25 = sphi %s2006_s25, %s2480_s25   ;;  %s1922_s24 = sphi %s2004_s24, %s2479_s24  }
   0x3   : > { %s173_s29 = ssub.s32 %s1930_s26, %s2019_s28  ;;  %s176_s30 = sadd.s32 1, %s1926_s25 }
   0x4   : > { %p174_p0 = scmp.eq.s32.totalorder %s173_s29, 0  ;;  %p186_p1 = scmp.ne.s32.totalorder %s1926_s25, %s1922_s24 }
   0x5   : > { %p187_p2 = scmp.eq.s32.totalorder %s2017_s27, 1  ;;  %p1512_p3 = scmp.ge.s32.totalorder %s1930_s26, 1 }
   0x6   : > { %s2027_s8 = scalar_select %p174_p0, %s1926_s25, %s176_s30  }
   0x7   : > { %p2029_p4 = por %p187_p2, %p186_p1  ;;  %p246_p5 = scmp.lt.s32.totalorder %s1930_s26, 3 }
   0x9   : > { %p247_p6 = pnand %p1512_p3, %p246_p5 }
   0xa   : > { %v1859_v0 = vld [vmem:[%s2466_s1] sm:$0x3f] (!%p247_p6)   ;;  %vm412_vm0 = vcmask (!%p247_p6), 1045504   ;;  %s2037_s12 = sshll.u32 (!%p247_p6), %s2017_s27, 5  ;;  %vm363_vm1 = vcmask (!%p247_p6), 97280   ;;  %v1861_v24 = vld [vmem:[%s2468_s3 + $0x8] sm:$0xff] (!%p247_p6)  }
   0xb   : > { %250 = sbr.rel (%p247_p6) target bundleno = 800 (0x320), region = 48  ;;  %v1860_v1 = vld [vmem:[%s2468_s3] sm:$0xff] (!%p247_p6)   ;;  %1769 = vmatprep.subr.msk.bf16.mxu0 (!%p247_p6), %vm412_vm0, %v1859_v0  ;;  %v414_v2 = vsel (!%p247_p6), %vm412_vm0, %v1859_v0, 0  ;;  %p286_p7 = scmp.lt.s32.totalorder (!%p247_p6), %s2037_s12, 37  ;;  %1770 = vmatprep.subr.msk.bf16.mxu1 (!%p247_p6), %vm412_vm0, %v1859_v0  ;;  %v1862_v30 = vld [vmem:[%s2468_s3 + $0x10] sm:$0xff] (!%p247_p6)   ;;  %v1863_v38 = vld [vmem:[%s2468_s3 + $0x18] sm:$0xff] (!%p247_p6)  }
   0xc   : > { %1638 = vmatpush3.bf16.msra.mxu0 (!%p247_p6), %v414_v2  ;;  %1768 = vmatpush3.bf16.msra.mxu1 (!%p247_p6), %v414_v2  ;;  %v1864_v46 = vld [vmem:[%s2468_s3 + $0x20] sm:$0xff] (!%p247_p6)   ;;  %v1865_v51 = vld [vmem:[%s2468_s3 + $0x28] sm:$0xff] (!%p247_p6)   ;;  %v1866_v56 = vld [vmem:[%s2468_s3 + $0x30] sm:$0xff] (!%p247_p6)   ;;  %s278_s22 = sand.u32 (!%p247_p6), 1, %s1922_s24   ;;  %vm1137_vm2 = vcmask (!%p247_p6), 15360  }
   0xd   : > { %1671 = vmatprep.subr.bf16.mxu1 (!%p247_p6), %v1860_v1  ;;  %v1867_v57 = vld [vmem:[%s2468_s3 + $0x38] sm:$0xff] (!%p247_p6)   ;;  %v1868_v58 = vld [vmem:[%s2470_s5] sm:$0xff] (!%p247_p6)   ;;  %v1869_v59 = vld [vmem:[%s2470_s5 + $0x8] sm:$0xff] (!%p247_p6)   ;;  %s1513_s23 = sshll.u32 (!%p247_p6), %s278_s22, 8 }
   0xe   : > { %1719 = vmatprep.subr.bf16.mxu0 (!%p247_p6), %v1868_v58  ;;  %v1870_v60 = vld [vmem:[%s2470_s5 + $0x10] sm:$0xff] (!%p247_p6)   ;;  %v1871_v61 = vld [vmem:[%s2470_s5 + $0x18] sm:$0xff] (!%p247_p6)   ;;  %v1872_v62 = vld [vmem:[%s2470_s5 + $0x20] sm:$0xff] (!%p247_p6)   ;;  %s2230_s30 = scalar_lea.vmem (!%p247_p6), [#allocation2], %s1513_s23  }
   0xf   : > { %v1873_v63 = vld [vmem:[%s2470_s5 + $0x28] sm:$0xff] (!%p247_p6)   ;;  %v2139_v0 = vld [vmem:[%s2467_s2] ss:$0 sm:$0xff] (!%p247_p6) }
  0x12   : > { %s287_s15 = scalar_select %p286_p7, %s2037_s12, 37 }
  0x13   : > { %s1178_s24 = ssub.s32 (%p2029_p4), 38, %s2037_s12  ;;  %s1569_s10 = sshll.u32 (%p2029_p4), %s2017_s27, 8 }
  0x14   : > { %s1515_s16 = sshll.u32 %s287_s15, 3  ;;  %p1179_p8 = scmp.lt.s32.totalorder (%p2029_p4), %s1178_s24, 32 }
  0x15   : > { %s2047_s19 = scalar_lea.vmem %s2465_s0, %s1515_s16  ;;  %s2333_s14 = scalar_lea.vmem (%p2029_p4), %s2472_s7, %s1569_s10  }
  0x16   : > { %v301_v3 = vld [vmem:[%s2047_s19] sm:$0xff]  ;;  %v302_v4 = vld [vmem:[%s2047_s19 + $0x8] sm:$0xff]  ;;  %v303_v5 = vld [vmem:[%s2047_s19 + $0x10] sm:$0xff] }
  0x17   : > { %v333_v6 = vpack.c.bf16 %v302_v4, %v301_v3  ;;  %v304_v7 = vld [vmem:[%s2047_s19 + $0x18] sm:$0xff]  ;;  %v305_v8 = vld [vmem:[%s2047_s19 + $0x20] sm:$0xff]  ;;  %v306_v9 = vld [vmem:[%s2047_s19 + $0x28] sm:$0xff] }
  0x18   : > { %v334_v10 = vpack.c.bf16 %v304_v7, %v303_v5  ;;  %v335_v11 = vpack.c.bf16 %v306_v9, %v305_v8  ;;  %v307_v12 = vld [vmem:[%s2047_s19 + $0x30] sm:$0xff]  ;;  %v308_v13 = vld [vmem:[%s2047_s19 + $0x38] sm:$0xff]  ;;  %v309_v14 = vld [vmem:[%s2047_s19 + $0x40] sm:$0xff] }
  0x19   : > { %1639 = vmatprep.mubr.msk.bf16.mxu0 %vm363_vm1, %v333_v6  ;;  %v310_v15 = vld [vmem:[%s2047_s19 + $0x48] sm:$0xff]  ;;  %v317_v16 = vld [vmem:[%s2047_s19 + $0x80] sm:$0xff]  ;;  %v319_v19 = vld [vmem:[%s2047_s19 + $0x90] sm:$0xff]  ;;  %v336_v25 = vpack.c.bf16 %v308_v13, %v307_v12 }
  0x1a   : > { %1640 = vmatmul.mubr.msk.bf16.vlgmr.msra.gmra.mrb[0].mxu0 %vm363_vm1, %v334_v10  ;;  %v318_v17 = vld [vmem:[%s2047_s19 + $0x88] sm:$0xff]  ;;  %v320_v20 = vld [vmem:[%s2047_s19 + $0x98] sm:$0xff]  ;;  %v321_v21 = vld [vmem:[%s2047_s19 + $0xa0] sm:$0xff]  ;;  %v337_v27 = vpack.c.bf16 %v310_v15, %v309_v14 }
  0x1b   : > { %1643 = vmatprep.mubr.msk.bf16.mxu0 %vm363_vm1, %v335_v11  ;;  %v341_v18 = vpack.c.bf16 %v318_v17, %v317_v16  ;;  %v342_v22 = vpack.c.bf16 %v320_v20, %v319_v19  ;;  %v322_v23 = vld [vmem:[%s2047_s19 + $0xa8] sm:$0xff]  ;;  %v323_v28 = vld [vmem:[%s2047_s19 + $0xb0] sm:$0xff]  ;;  %v324_v29 = vld [vmem:[%s2047_s19 + $0xb8] sm:$0xff]  ;;  %1720 = vmatpush3.bf16.msra.mxu0 %v1868_v58 }
  0x1c   : > { %v343_v26 = vpack.c.bf16 %v322_v23, %v321_v21  ;;  %v325_v31 = vld [vmem:[%s2047_s19 + $0xc0] sm:$0xff]  ;;  %v326_v32 = vld [vmem:[%s2047_s19 + $0xc8] sm:$0xff]  ;;  %v311_v33 = vld [vmem:[%s2047_s19 + $0x50] sm:$0xff]  ;;  %v344_v37 = vpack.c.bf16 %v324_v29, %v323_v28  ;;  %1721 = vmatprep.subr.bf16.mxu0 %v1869_v59 }
  0x1d   : > { %1655 = vmatprep.mubr.msk.bf16.mxu1 %vm363_vm1, %v341_v18  ;;  %v312_v34 = vld [vmem:[%s2047_s19 + $0x58] sm:$0xff]  ;;  %v313_v35 = vld [vmem:[%s2047_s19 + $0x60] sm:$0xff]  ;;  %v314_v36 = vld [vmem:[%s2047_s19 + $0x68] sm:$0xff]  ;;  %v345_v39 = vpack.c.bf16 %v326_v32, %v325_v31 }
  0x1e   : > { %1656 = vmatmul.mubr.msk.bf16.vlgmr.msra.gmra.mrb[0].mxu1 %vm363_vm1, %v342_v22  ;;  %v338_v40 = vpack.c.bf16 %v312_v34, %v311_v33  ;;  %v339_v41 = vpack.c.bf16 %v314_v36, %v313_v35  ;;  %v327_v42 = vld [vmem:[%s2047_s19 + $0xd0] sm:$0xff]  ;;  %v328_v43 = vld [vmem:[%s2047_s19 + $0xd8] sm:$0xff]  ;;  %v329_v44 = vld [vmem:[%s2047_s19 + $0xe0] sm:$0xff] }
  0x1f   : > { %1659 = vmatprep.mubr.msk.bf16.mxu1 %vm363_vm1, %v343_v26  ;;  %1672 = vmatpush3.bf16.msra.mxu1 %v1860_v1  ;;  %v330_v45 = vld [vmem:[%s2047_s19 + $0xe8] sm:$0xff]  ;;  %v315_v47 = vld [vmem:[%s2047_s19 + $0x70] sm:$0xff]  ;;  %v316_v48 = vld [vmem:[%s2047_s19 + $0x78] sm:$0xff]  ;;  %v346_v49 = vpack.c.bf16 %v328_v43, %v327_v42 }
  0x20   : > { %1673 = vmatprep.subr.bf16.mxu1 %v1861_v24  ;;  %v347_v50 = vpack.c.bf16 %v330_v45, %v329_v44  ;;  %v340_v52 = vpack.c.bf16 %v316_v48, %v315_v47  ;;  %v331_v53 = vld [vmem:[%s2047_s19 + $0xf0] sm:$0xff]  ;;  %v332_v54 = vld [vmem:[%s2047_s19 + $0xf8] sm:$0xff]  ;;  %1722 = vmatpush3.bf16.msra.mxu0 %v1869_v59 }
  0x21   : > { %v348_v55 = vpack.c.bf16 %v332_v54, %v331_v53  ;;  %1723 = vmatprep.subr.bf16.mxu0 %v1870_v60 }
  0x22   : > { %1644 = vmatmul.mubr.msk.bf16.gmra.mrb[4].mxu0 %vm363_vm1, %v336_v25 }
  0x23   : > { %1647 = vmatprep.mubr.msk.bf16.mxu0 %vm363_vm1, %v337_v27  ;;  %1674 = vmatpush3.bf16.msra.mxu1 %v1861_v24 }
  0x24   : > { %1675 = vmatprep.subr.bf16.mxu1 %v1862_v30  ;;  %1724 = vmatpush3.bf16.msra.mxu0 %v1870_v60 }
  0x25   : > { %1725 = vmatprep.subr.bf16.mxu0 %v1871_v61 }
  0x26   : > { %1660 = vmatmul.mubr.msk.bf16.gmra.mrb[4].mxu1 %vm363_vm1, %v344_v37 }
  0x27   : > { %1663 = vmatprep.mubr.msk.bf16.mxu1 %vm363_vm1, %v345_v39  ;;  %1676 = vmatpush3.bf16.msra.mxu1 %v1862_v30 }
  0x28   : > { %1677 = vmatprep.subr.bf16.mxu1 %v1863_v38  ;;  %1726 = vmatpush3.bf16.msra.mxu0 %v1871_v61 }
  0x29   : > { %1727 = vmatprep.subr.bf16.mxu0 %v1872_v62 }
  0x2a   : > { %1648 = vmatmul.mubr.msk.bf16.gmra.mrb[8].mxu0 %vm363_vm1, %v338_v40 }
  0x2b   : > { %1651 = vmatprep.mubr.msk.bf16.mxu0 %vm363_vm1, %v339_v41  ;;  %1678 = vmatpush3.bf16.msra.mxu1 %v1863_v38 }
  0x2c   : > { %1679 = vmatprep.subr.bf16.mxu1 %v1864_v46  ;;  %1728 = vmatpush3.bf16.msra.mxu0 %v1872_v62 }
  0x2d   : > { %1729 = vmatprep.subr.bf16.mxu0 %v1873_v63 }
  0x2e   : > { %1664 = vmatmul.mubr.msk.bf16.gmra.mrb[8].mxu1 %vm363_vm1, %v346_v49 }
  0x2f   : > { %1667 = vmatprep.mubr.msk.bf16.mxu1 %vm363_vm1, %v347_v50  ;;  %1680 = vmatpush3.bf16.msra.mxu1 %v1864_v46 }
  0x30   : > { %1681 = vmatprep.subr.bf16.mxu1 %v1865_v51  ;;  %1730 = vmatpush3.bf16.msra.mxu0 %v1873_v63 }
  0x32   : > { %1652 = vmatmul.mubr.msk.bf16.gmra.mrb[12].mxu0 %vm363_vm1, %v340_v52 }
  0x33   : > { %1682 = vmatpush3.bf16.msra.mxu1 %v1865_v51 }
  0x34   : > { %1683 = vmatprep.subr.bf16.mxu1 %v1866_v56 }
  0x36   : > { %1668 = vmatmul.mubr.msk.bf16.gmra.mrb[12].mxu1 %vm363_vm1, %v348_v55 }
  0x37   : > { %1684 = vmatpush3.bf16.msra.mxu1 %v1866_v56 }
  0x38   : > { %1685 = vmatprep.subr.bf16.mxu1 %v1867_v57 }
  0x3b   : > { %1686 = vmatpush3.bf16.msra.mxu1 %v1867_v57 }
  0xed   : > { %v1641_v1 = vpop.f32.mrb[0].mxu0 }
  0xee   : > { %v459_v2 = vadd.f32 %v1641_v1, %v2139_v0  ;;  %v450_v3 = vpop.f32.mrb[1].mxu0 }
  0xef   : > { %v451_v4 = vadd.f32 %v2139_v0, %v450_v3  ;;  %v1642_v5 = vpop.f32.mrb[2].mxu0 }
  0xf0   : > { %v462_v6 = vadd.f32 %v1642_v5, %v2139_v0  ;;  %v453_v7 = vpop.f32.mrb[3].mxu0  ;;  %v579_v9 = vmax.f32 %v459_v2, 0.0 }
  0xf1   : > { %v454_v8 = vadd.f32 %v2139_v0, %v453_v7  ;;  %v1657_v11 = vpop.f32.mrb[0].mxu1  ;;  %v577_v12 = vmax.f32 %v451_v4, 0.0 }
  0xf2   : > { %v580_v10 = vmax.f32 %v462_v6, 0.0  ;;  %v523_v14 = vadd.f32 %v1657_v11, %v2139_v0  ;;  %v514_v15 = vpop.f32.mrb[1].mxu1 }
  0xf3   : > { %v578_v13 = vmax.f32 %v454_v8, 0.0  ;;  %v515_v17 = vadd.f32 %v2139_v0, %v514_v15  ;;  %v1658_v18 = vpop.f32.mrb[2].mxu1 }
  0xf4   : > { %v610_v16 = vpack.c.bf16 %v580_v10, %v579_v9  ;;  %v595_v21 = vmax.f32 %v523_v14, 0.0  ;;  %v526_v22 = vadd.f32 %v1658_v18, %v2139_v0  ;;  %v517_v23 = vpop.f32.mrb[3].mxu1 }
  0xf5   : > { %v609_v19 = vpack.c.bf16 %v578_v13, %v577_v12  ;;  %v1645_v20 = vpop.f32.mrb[4].mxu0  ;;  %v593_v26 = vmax.f32 %v515_v17, 0.0  ;;  %v518_v27 = vadd.f32 %v2139_v0, %v517_v23 }
  0xf6   : > { %v475_v24 = vadd.f32 %v1645_v20, %v2139_v0  ;;  %v466_v25 = vpop.f32.mrb[5].mxu0  ;;  %v596_v30 = vmax.f32 %v526_v22, 0.0 }
  0xf7   : > { %v467_v28 = vadd.f32 %v2139_v0, %v466_v25  ;;  %v1646_v29 = vpop.f32.mrb[6].mxu0  ;;  %1687 = vmatprep.mubr.bf16.mxu1 %v609_v19  ;;  %v594_v33 = vmax.f32 %v518_v27, 0.0 }
  0xf8   : > { %v478_v31 = vadd.f32 %v1646_v29, %v2139_v0  ;;  %v469_v32 = vpop.f32.mrb[7].mxu0  ;;  %1688 = vmatmul.mubr.bf16.vlgmr.msra.gmra.mrb[16].mxu1 %v610_v16  ;;  %v2153_v35 = vpack.c.bf16 %v596_v30, %v595_v21  ;;  %v583_v36 = vmax.f32 %v475_v24, 0.0 }
  0xf9   : > { %v470_v34 = vadd.f32 %v2139_v0, %v469_v32  ;;  %v2155_v38 = vpack.c.bf16 %v594_v33, %v593_v26  ;;  %v1661_v39 = vpop.f32.mrb[4].mxu1  ;;  %v581_v40 = vmax.f32 %v467_v28, 0.0 }
  0xfa   : > { %v584_v37 = vmax.f32 %v478_v31, 0.0  ;;  %v539_v42 = vadd.f32 %v1661_v39, %v2139_v0  ;;  %v530_v43 = vpop.f32.mrb[5].mxu1 }
  0xfb   : > { %v582_v41 = vmax.f32 %v470_v34, 0.0  ;;  %v531_v45 = vadd.f32 %v2139_v0, %v530_v43  ;;  %v1662_v46 = vpop.f32.mrb[6].mxu1 }
  0xfc   : > { %v612_v44 = vpack.c.bf16 %v584_v37, %v583_v36  ;;  %v599_v49 = vmax.f32 %v539_v42, 0.0  ;;  %v542_v50 = vadd.f32 %v1662_v46, %v2139_v0  ;;  %v533_v51 = vpop.f32.mrb[7].mxu1 }
  0xfd   : > { %v611_v47 = vpack.c.bf16 %v582_v41, %v581_v40  ;;  %v1649_v48 = vpop.f32.mrb[8].mxu0  ;;  %v597_v54 = vmax.f32 %v531_v45, 0.0  ;;  %v534_v55 = vadd.f32 %v2139_v0, %v533_v51 }
  0xfe   : > { %v491_v52 = vadd.f32 %v1649_v48, %v2139_v0  ;;  %v482_v53 = vpop.f32.mrb[9].mxu0  ;;  %v600_v58 = vmax.f32 %v542_v50, 0.0 }
  0xff   : > { %v483_v56 = vadd.f32 %v2139_v0, %v482_v53  ;;  %v1650_v57 = vpop.f32.mrb[10].mxu0  ;;  %1691 = vmatprep.mubr.bf16.mxu1 %v611_v47  ;;  %v598_v61 = vmax.f32 %v534_v55, 0.0 }
 0x100   : > { %v494_v59 = vadd.f32 %v1650_v57, %v2139_v0  ;;  %v485_v60 = vpop.f32.mrb[11].mxu0  ;;  %1692 = vmatmul.mubr.bf16.gmra.mrb[20].mxu1 %v612_v44  ;;  %v620_v63 = vpack.c.bf16 %v600_v58, %v599_v49  ;;  %v587_v1 = vmax.f32 %v491_v52, 0.0 }
 0x101   : > { %v486_v62 = vadd.f32 %v2139_v0, %v485_v60  ;;  %v619_v3 = vpack.c.bf16 %v598_v61, %v597_v54  ;;  %v1665_v4 = vpop.f32.mrb[8].mxu1  ;;  %v585_v5 = vmax.f32 %v483_v56, 0.0 }
 0x102   : > { %v588_v2 = vmax.f32 %v494_v59, 0.0  ;;  %v555_v7 = vadd.f32 %v1665_v4, %v2139_v0  ;;  %v546_v8 = vpop.f32.mrb[9].mxu1 }
 0x103   : > { %v586_v6 = vmax.f32 %v486_v62, 0.0  ;;  %v547_v10 = vadd.f32 %v2139_v0, %v546_v8  ;;  %v1666_v11 = vpop.f32.mrb[10].mxu1 }
 0x104   : > { %v614_v9 = vpack.c.bf16 %v588_v2, %v587_v1  ;;  %v603_v14 = vmax.f32 %v555_v7, 0.0  ;;  %v558_v15 = vadd.f32 %v1666_v11, %v2139_v0  ;;  %v549_v16 = vpop.f32.mrb[11].mxu1 }
 0x105   : > { %v613_v12 = vpack.c.bf16 %v586_v6, %v585_v5  ;;  %v1653_v13 = vpop.f32.mrb[12].mxu0  ;;  %v601_v19 = vmax.f32 %v547_v10, 0.0  ;;  %v550_v20 = vadd.f32 %v2139_v0, %v549_v16 }
 0x106   : > { %v507_v17 = vadd.f32 %v1653_v13, %v2139_v0  ;;  %v498_v18 = vpop.f32.mrb[13].mxu0  ;;  %v604_v23 = vmax.f32 %v558_v15, 0.0 }
 0x107   : > { %v499_v21 = vadd.f32 %v2139_v0, %v498_v18  ;;  %v1654_v22 = vpop.f32.mrb[14].mxu0  ;;  %1695 = vmatprep.mubr.bf16.mxu1 %v613_v12  ;;  %v602_v26 = vmax.f32 %v550_v20, 0.0 }
 0x108   : > { %v510_v24 = vadd.f32 %v1654_v22, %v2139_v0  ;;  %v501_v25 = vpop.f32.mrb[15].mxu0  ;;  %1696 = vmatmul.mubr.bf16.gmra.mrb[24].mxu1 %v614_v9  ;;  %v622_v28 = vpack.c.bf16 %v604_v23, %v603_v14  ;;  %v591_v29 = vmax.f32 %v507_v17, 0.0 }
 0x109   : > { %v502_v27 = vadd.f32 %v2139_v0, %v501_v25  ;;  %v621_v31 = vpack.c.bf16 %v602_v26, %v601_v19  ;;  %v1669_v32 = vpop.f32.mrb[12].mxu1  ;;  %v589_v33 = vmax.f32 %v499_v21, 0.0 }
 0x10a   : > { %v592_v30 = vmax.f32 %v510_v24, 0.0  ;;  %v571_v36 = vadd.f32 %v1669_v32, %v2139_v0  ;;  %v562_v37 = vpop.f32.mrb[13].mxu1 }
 0x10b   : > { %v590_v34 = vmax.f32 %v502_v27, 0.0  ;;  %v563_v40 = vadd.f32 %v2139_v0, %v562_v37  ;;  %v1670_v41 = vpop.f32.mrb[14].mxu1 }
 0x10c   : > { %v616_v39 = vpack.c.bf16 %v592_v30, %v591_v29  ;;  %v607_v43 = vmax.f32 %v571_v36, 0.0  ;;  %v574_v44 = vadd.f32 %v1670_v41, %v2139_v0  ;;  %v565_v45 = vpop.f32.mrb[15].mxu1 }
 0x10d   : > { %v615_v42 = vpack.c.bf16 %v590_v34, %v589_v33  ;;  %v605_v46 = vmax.f32 %v563_v40, 0.0  ;;  %v566_v47 = vadd.f32 %v2139_v0, %v565_v45  ;;  %v1874_v0 = vld [vmem:[%s2470_s5 + $0x30] sm:$0xff]  }
 0x10e   : > { %v608_v48 = vmax.f32 %v574_v44, 0.0  ;;  %1731 = vmatprep.subr.bf16.mxu0 %v1874_v0 }
 0x10f   : > { %1699 = vmatprep.mubr.bf16.mxu1 %v615_v42  ;;  %v606_v49 = vmax.f32 %v566_v47, 0.0  ;;  %1732 = vmatpush3.bf16.msra.mxu0 %v1874_v0 }
 0x110   : > { %1700 = vmatmul.mubr.bf16.gmra.mrb[28].mxu1 %v616_v39  ;;  %v624_v50 = vpack.c.bf16 %v608_v48, %v607_v43 }
 0x111   : > { %1703 = vmatprep.mubr.bf16.mxu1 %v2155_v38  ;;  %v623_v51 = vpack.c.bf16 %v606_v49, %v605_v46  ;;  %v1875_v38 = vld [vmem:[%s2470_s5 + $0x38] sm:$0xff]  }
 0x112   : > { %1733 = vmatprep.subr.bf16.mxu0 %v1875_v38 }
 0x113   : > { %1734 = vmatpush3.bf16.msra.mxu0 %v1875_v38 }
 0x118   : > { %1704 = vmatmul.mubr.bf16.gmra.mrb[32].mxu1 %v2153_v35  ;;  %v2188_v35 = vld [vmem:[%s2469_s4] ss:$0 sm:$0xff] }
 0x119   : > { %1707 = vmatprep.mubr.bf16.mxu1 %v619_v3 }
 0x120   : > { %1708 = vmatmul.mubr.bf16.gmra.mrb[36].mxu1 %v620_v63 }
 0x121   : > { %1711 = vmatprep.mubr.bf16.mxu1 %v621_v31 }
 0x128   : > { %1712 = vmatmul.mubr.bf16.gmra.mrb[40].mxu1 %v622_v28 }
 0x129   : > { %1715 = vmatprep.mubr.bf16.mxu1 %v623_v51 }
 0x130   : > { %1716 = vmatmul.mubr.bf16.gmra.mrb[44].mxu1 %v624_v50 }
 0x1cb   : > { %v1689_v52 = vpop.f32.mrb[16].mxu1 }
 0x1cc   : > { %v739_v53 = vadd.f32 %v1689_v52, %v2188_v35  ;;  %v730_v54 = vpop.f32.mrb[17].mxu1 }
 0x1cd   : > { %v731_v55 = vadd.f32 %v2188_v35, %v730_v54  ;;  %v1690_v56 = vpop.f32.mrb[18].mxu1 }
 0x1ce   : > { %v742_v57 = vadd.f32 %v1690_v56, %v2188_v35  ;;  %v733_v58 = vpop.f32.mrb[19].mxu1  ;;  %v859_v60 = vmax.f32 %v739_v53, 0.0 }
 0x1cf   : > { %v734_v59 = vadd.f32 %v2188_v35, %v733_v58  ;;  %v857_v62 = vmax.f32 %v731_v55, 0.0 }
 0x1d0   : > { %v860_v61 = vmax.f32 %v742_v57, 0.0 }
 0x1d1   : > { %v858_v63 = vmax.f32 %v734_v59, 0.0 }
 0x1d2   : > { %v890_v1 = vpack.c.bf16 %v860_v61, %v859_v60 }
 0x1d3   : > { %v889_v2 = vpack.c.bf16 %v858_v63, %v857_v62  ;;  %v1693_v3 = vpop.f32.mrb[20].mxu1 }
 0x1d4   : > { %v755_v4 = vadd.f32 %v1693_v3, %v2188_v35  ;;  %v746_v5 = vpop.f32.mrb[21].mxu1 }
 0x1d5   : > { %v747_v6 = vadd.f32 %v2188_v35, %v746_v5  ;;  %v1694_v7 = vpop.f32.mrb[22].mxu1  ;;  %1735 = vmatprep.mubr.bf16.mxu0 %v889_v2 }
 0x1d6   : > { %v758_v8 = vadd.f32 %v1694_v7, %v2188_v35  ;;  %v749_v9 = vpop.f32.mrb[23].mxu1  ;;  %1736 = vmatmul.mubr.bf16.vlgmr.msra.gmra.mrb[16].mxu0 %v890_v1  ;;  %v863_v11 = vmax.f32 %v755_v4, 0.0 }
 0x1d7   : > { %v750_v10 = vadd.f32 %v2188_v35, %v749_v9  ;;  %v861_v13 = vmax.f32 %v747_v6, 0.0 }
 0x1d8   : > { %v864_v12 = vmax.f32 %v758_v8, 0.0 }
 0x1d9   : > { %v862_v14 = vmax.f32 %v750_v10, 0.0 }
 0x1da   : > { %v892_v15 = vpack.c.bf16 %v864_v12, %v863_v11 }
 0x1db   : > { %v891_v16 = vpack.c.bf16 %v862_v14, %v861_v13  ;;  %v1697_v17 = vpop.f32.mrb[24].mxu1 }
 0x1dc   : > { %v771_v18 = vadd.f32 %v1697_v17, %v2188_v35  ;;  %v762_v19 = vpop.f32.mrb[25].mxu1 }
 0x1dd   : > { %v763_v20 = vadd.f32 %v2188_v35, %v762_v19  ;;  %v1698_v21 = vpop.f32.mrb[26].mxu1  ;;  %1739 = vmatprep.mubr.bf16.mxu0 %v891_v16 }
 0x1de   : > { %v774_v22 = vadd.f32 %v1698_v21, %v2188_v35  ;;  %v765_v23 = vpop.f32.mrb[27].mxu1  ;;  %1740 = vmatmul.mubr.bf16.gmra.mrb[20].mxu0 %v892_v15  ;;  %v867_v25 = vmax.f32 %v771_v18, 0.0 }
 0x1df   : > { %v766_v24 = vadd.f32 %v2188_v35, %v765_v23  ;;  %v865_v27 = vmax.f32 %v763_v20, 0.0 }
 0x1e0   : > { %v868_v26 = vmax.f32 %v774_v22, 0.0 }
 0x1e1   : > { %v866_v28 = vmax.f32 %v766_v24, 0.0 }
 0x1e2   : > { %v894_v29 = vpack.c.bf16 %v868_v26, %v867_v25 }
 0x1e3   : > { %v893_v30 = vpack.c.bf16 %v866_v28, %v865_v27  ;;  %v1701_v31 = vpop.f32.mrb[28].mxu1 }
 0x1e4   : > { %v787_v32 = vadd.f32 %v1701_v31, %v2188_v35  ;;  %v778_v33 = vpop.f32.mrb[29].mxu1 }
 0x1e5   : > { %v779_v34 = vadd.f32 %v2188_v35, %v778_v33  ;;  %v1702_v36 = vpop.f32.mrb[30].mxu1  ;;  %1743 = vmatprep.mubr.bf16.mxu0 %v893_v30 }
 0x1e6   : > { %v790_v37 = vadd.f32 %v1702_v36, %v2188_v35  ;;  %v781_v39 = vpop.f32.mrb[31].mxu1  ;;  %1744 = vmatmul.mubr.bf16.gmra.mrb[24].mxu0 %v894_v29  ;;  %v871_v41 = vmax.f32 %v787_v32, 0.0 }
 0x1e7   : > { %v782_v40 = vadd.f32 %v2188_v35, %v781_v39  ;;  %v869_v43 = vmax.f32 %v779_v34, 0.0 }
 0x1e8   : > { %v872_v42 = vmax.f32 %v790_v37, 0.0 }
 0x1e9   : > { %v870_v44 = vmax.f32 %v782_v40, 0.0  ;;  %v2226_v40 = vld [vmem:[%s2471_s6] ss:$0 sm:$0xff] }
 0x1ea   : > { %v896_v45 = vpack.c.bf16 %v872_v42, %v871_v41 }
 0x1eb   : > { %v895_v46 = vpack.c.bf16 %v870_v44, %v869_v43  ;;  %v1705_v47 = vpop.f32.mrb[32].mxu1 }
 0x1ec   : > { %v803_v48 = vadd.f32 %v1705_v47, %v2188_v35  ;;  %v794_v49 = vpop.f32.mrb[33].mxu1 }
 0x1ed   : > { %v795_v50 = vadd.f32 %v2188_v35, %v794_v49  ;;  %v1706_v51 = vpop.f32.mrb[34].mxu1  ;;  %1747 = vmatprep.mubr.bf16.mxu0 %v895_v46 }
 0x1ee   : > { %v806_v0 = vadd.f32 %v1706_v51, %v2188_v35  ;;  %v797_v38 = vpop.f32.mrb[35].mxu1  ;;  %1748 = vmatmul.mubr.bf16.gmra.mrb[28].mxu0 %v896_v45  ;;  %v875_v53 = vmax.f32 %v803_v48, 0.0 }
 0x1ef   : > { %v798_v52 = vadd.f32 %v2188_v35, %v797_v38  ;;  %v873_v55 = vmax.f32 %v795_v50, 0.0 }
 0x1f0   : > { %v876_v54 = vmax.f32 %v806_v0, 0.0 }
 0x1f1   : > { %v874_v56 = vmax.f32 %v798_v52, 0.0 }
 0x1f2   : > { %v898_v57 = vpack.c.bf16 %v876_v54, %v875_v53 }
 0x1f3   : > { %v897_v58 = vpack.c.bf16 %v874_v56, %v873_v55  ;;  %v1709_v59 = vpop.f32.mrb[36].mxu1 }
 0x1f4   : > { %v819_v60 = vadd.f32 %v1709_v59, %v2188_v35  ;;  %v810_v61 = vpop.f32.mrb[37].mxu1 }
 0x1f5   : > { %v811_v62 = vadd.f32 %v2188_v35, %v810_v61  ;;  %v1710_v63 = vpop.f32.mrb[38].mxu1  ;;  %1751 = vmatprep.mubr.bf16.mxu0 %v897_v58 }
 0x1f6   : > { %v822_v1 = vadd.f32 %v1710_v63, %v2188_v35  ;;  %v813_v2 = vpop.f32.mrb[39].mxu1  ;;  %1752 = vmatmul.mubr.bf16.gmra.mrb[32].mxu0 %v898_v57  ;;  %v879_v4 = vmax.f32 %v819_v60, 0.0 }
 0x1f7   : > { %v814_v3 = vadd.f32 %v2188_v35, %v813_v2  ;;  %v877_v6 = vmax.f32 %v811_v62, 0.0 }
 0x1f8   : > { %v880_v5 = vmax.f32 %v822_v1, 0.0 }
 0x1f9   : > { %v878_v7 = vmax.f32 %v814_v3, 0.0 }
 0x1fa   : > { %v900_v8 = vpack.c.bf16 %v880_v5, %v879_v4 }
 0x1fb   : > { %v899_v9 = vpack.c.bf16 %v878_v7, %v877_v6  ;;  %v1713_v10 = vpop.f32.mrb[40].mxu1 }
 0x1fc   : > { %v835_v11 = vadd.f32 %v1713_v10, %v2188_v35  ;;  %v826_v12 = vpop.f32.mrb[41].mxu1 }
 0x1fd   : > { %v827_v13 = vadd.f32 %v2188_v35, %v826_v12  ;;  %v1714_v14 = vpop.f32.mrb[42].mxu1  ;;  %1755 = vmatprep.mubr.bf16.mxu0 %v899_v9 }
 0x1fe   : > { %v838_v15 = vadd.f32 %v1714_v14, %v2188_v35  ;;  %v829_v16 = vpop.f32.mrb[43].mxu1  ;;  %1756 = vmatmul.mubr.bf16.gmra.mrb[36].mxu0 %v900_v8  ;;  %v883_v18 = vmax.f32 %v835_v11, 0.0 }
 0x1ff   : > { %v830_v17 = vadd.f32 %v2188_v35, %v829_v16  ;;  %v881_v20 = vmax.f32 %v827_v13, 0.0 }
 0x200   : > { %v884_v19 = vmax.f32 %v838_v15, 0.0 }
 0x201   : > { %v882_v21 = vmax.f32 %v830_v17, 0.0 }
 0x202   : > { %v902_v22 = vpack.c.bf16 %v884_v19, %v883_v18 }
 0x203   : > { %v901_v23 = vpack.c.bf16 %v882_v21, %v881_v20  ;;  %v1717_v24 = vpop.f32.mrb[44].mxu1 }
 0x204   : > { %v851_v25 = vadd.f32 %v1717_v24, %v2188_v35  ;;  %v842_v26 = vpop.f32.mrb[45].mxu1 }
 0x205   : > { %v843_v27 = vadd.f32 %v2188_v35, %v842_v26  ;;  %v1718_v28 = vpop.f32.mrb[46].mxu1  ;;  %1759 = vmatprep.mubr.bf16.mxu0 %v901_v23 }
 0x206   : > { %v854_v29 = vadd.f32 %v1718_v28, %v2188_v35  ;;  %v845_v30 = vpop.f32.mrb[47].mxu1  ;;  %1760 = vmatmul.mubr.bf16.gmra.mrb[40].mxu0 %v902_v22  ;;  %v887_v32 = vmax.f32 %v851_v25, 0.0 }
 0x207   : > { %v846_v31 = vadd.f32 %v2188_v35, %v845_v30  ;;  %v885_v34 = vmax.f32 %v843_v27, 0.0 }
 0x208   : > { %v888_v33 = vmax.f32 %v854_v29, 0.0 }
 0x209   : > { %v886_v36 = vmax.f32 %v846_v31, 0.0 }
 0x20a   : > { %v904_v37 = vpack.c.bf16 %v888_v33, %v887_v32 }
 0x20b   : > { %v903_v39 = vpack.c.bf16 %v886_v36, %v885_v34 }
 0x20d   : > { %1763 = vmatprep.mubr.bf16.mxu0 %v903_v39 }
 0x20e   : > { %1764 = vmatmul.mubr.bf16.gmra.mrb[44].mxu0 %v904_v37 }
 0x2a9   : > { %v1737_v41 = vpop.f32.mrb[16].mxu0 }
 0x2aa   : > { %v1019_v42 = vadd.f32 %v1737_v41, %v2226_v40  ;;  %v1010_v35 = vpop.f32.mrb[17].mxu0 }
 0x2ab   : > { %v1011_v43 = vadd.f32 %v2226_v40, %v1010_v35  ;;  %v1738_v44 = vpop.f32.mrb[18].mxu0 }
 0x2ac   : > { %1140 = vst.msk [vmem:[%s2230_s30 + $0x10] sm:$0xff] %vm1137_vm2, %v1019_v42  ;;  %v1022_v45 = vadd.f32 %v1738_v44, %v2226_v40  ;;  %v1013_v46 = vpop.f32.mrb[19].mxu0 }
 0x2ad   : > { %1138 = vst.msk [vmem:[%s2230_s30] sm:$0xff] %vm1137_vm2, %v1011_v43  ;;  %v1014_v47 = vadd.f32 %v2226_v40, %v1013_v46 }
 0x2ae   : > { %1141 = vst.msk [vmem:[%s2230_s30 + $0x18] sm:$0xff] %vm1137_vm2, %v1022_v45 }
 0x2af   : > { %1139 = vst.msk [vmem:[%s2230_s30 + $0x8] sm:$0xff] %vm1137_vm2, %v1014_v47 }
 0x2b1   : > { %v1741_v48 = vpop.f32.mrb[20].mxu0 }
 0x2b2   : > { %v1035_v49 = vadd.f32 %v1741_v48, %v2226_v40  ;;  %v1026_v50 = vpop.f32.mrb[21].mxu0 }
 0x2b3   : > { %v1027_v51 = vadd.f32 %v2226_v40, %v1026_v50  ;;  %v1742_v0 = vpop.f32.mrb[22].mxu0 }
 0x2b4   : > { %1144 = vst.msk [vmem:[%s2230_s30 + $0x30] sm:$0xff] %vm1137_vm2, %v1035_v49  ;;  %v1038_v38 = vadd.f32 %v1742_v0, %v2226_v40  ;;  %v1029_v52 = vpop.f32.mrb[23].mxu0 }
 0x2b5   : > { %1142 = vst.msk [vmem:[%s2230_s30 + $0x20] sm:$0xff] %vm1137_vm2, %v1027_v51  ;;  %v1030_v53 = vadd.f32 %v2226_v40, %v1029_v52 }
 0x2b6   : > { %1145 = vst.msk [vmem:[%s2230_s30 + $0x38] sm:$0xff] %vm1137_vm2, %v1038_v38 }
 0x2b7   : > { %1143 = vst.msk [vmem:[%s2230_s30 + $0x28] sm:$0xff] %vm1137_vm2, %v1030_v53 }
 0x2b9   : > { %v1745_v54 = vpop.f32.mrb[24].mxu0 }
 0x2ba   : > { %v1051_v55 = vadd.f32 %v1745_v54, %v2226_v40  ;;  %v1042_v56 = vpop.f32.mrb[25].mxu0 }
 0x2bb   : > { %v1043_v57 = vadd.f32 %v2226_v40, %v1042_v56  ;;  %v1746_v58 = vpop.f32.mrb[26].mxu0 }
 0x2bc   : > { %1148 = vst.msk [vmem:[%s2230_s30 + $0x50] sm:$0xff] %vm1137_vm2, %v1051_v55  ;;  %v1054_v59 = vadd.f32 %v1746_v58, %v2226_v40  ;;  %v1045_v60 = vpop.f32.mrb[27].mxu0 }
 0x2bd   : > { %1146 = vst.msk [vmem:[%s2230_s30 + $0x40] sm:$0xff] %vm1137_vm2, %v1043_v57  ;;  %v1046_v61 = vadd.f32 %v2226_v40, %v1045_v60 }
 0x2be   : > { %1149 = vst.msk [vmem:[%s2230_s30 + $0x58] sm:$0xff] %vm1137_vm2, %v1054_v59 }
 0x2bf   : > { %1147 = vst.msk [vmem:[%s2230_s30 + $0x48] sm:$0xff] %vm1137_vm2, %v1046_v61 }
 0x2c1   : > { %v1749_v62 = vpop.f32.mrb[28].mxu0 }
 0x2c2   : > { %v1067_v63 = vadd.f32 %v1749_v62, %v2226_v40  ;;  %v1058_v1 = vpop.f32.mrb[29].mxu0 }
 0x2c3   : > { %v1059_v2 = vadd.f32 %v2226_v40, %v1058_v1  ;;  %v1750_v3 = vpop.f32.mrb[30].mxu0 }
 0x2c4   : > { %1152 = vst.msk [vmem:[%s2230_s30 + $0x70] sm:$0xff] %vm1137_vm2, %v1067_v63  ;;  %v1070_v4 = vadd.f32 %v1750_v3, %v2226_v40  ;;  %v1061_v5 = vpop.f32.mrb[31].mxu0 }
 0x2c5   : > { %1150 = vst.msk [vmem:[%s2230_s30 + $0x60] sm:$0xff] %vm1137_vm2, %v1059_v2  ;;  %v1062_v6 = vadd.f32 %v2226_v40, %v1061_v5 }
 0x2c6   : > { %1153 = vst.msk [vmem:[%s2230_s30 + $0x78] sm:$0xff] %vm1137_vm2, %v1070_v4 }
 0x2c7   : > { %1151 = vst.msk [vmem:[%s2230_s30 + $0x68] sm:$0xff] %vm1137_vm2, %v1062_v6 }
 0x2c9   : > { %v1753_v7 = vpop.f32.mrb[32].mxu0 }
 0x2ca   : > { %v1083_v8 = vadd.f32 %v1753_v7, %v2226_v40  ;;  %v1074_v9 = vpop.f32.mrb[33].mxu0 }
 0x2cb   : > { %v1075_v10 = vadd.f32 %v2226_v40, %v1074_v9  ;;  %v1754_v11 = vpop.f32.mrb[34].mxu0 }
 0x2cc   : > { %1156 = vst.msk [vmem:[%s2230_s30 + $0x90] sm:$0xff] %vm1137_vm2, %v1083_v8  ;;  %v1086_v12 = vadd.f32 %v1754_v11, %v2226_v40  ;;  %v1077_v13 = vpop.f32.mrb[35].mxu0 }
 0x2cd   : > { %1154 = vst.msk [vmem:[%s2230_s30 + $0x80] sm:$0xff] %vm1137_vm2, %v1075_v10  ;;  %v1078_v14 = vadd.f32 %v2226_v40, %v1077_v13 }
 0x2ce   : > { %1157 = vst.msk [vmem:[%s2230_s30 + $0x98] sm:$0xff] %vm1137_vm2, %v1086_v12 }
 0x2cf   : > { %1155 = vst.msk [vmem:[%s2230_s30 + $0x88] sm:$0xff] %vm1137_vm2, %v1078_v14 }
 0x2d1   : > { %v1757_v15 = vpop.f32.mrb[36].mxu0 }
 0x2d2   : > { %v1099_v16 = vadd.f32 %v1757_v15, %v2226_v40  ;;  %v1090_v17 = vpop.f32.mrb[37].mxu0 }
 0x2d3   : > { %v1091_v18 = vadd.f32 %v2226_v40, %v1090_v17  ;;  %v1758_v19 = vpop.f32.mrb[38].mxu0 }
 0x2d4   : > { %1160 = vst.msk [vmem:[%s2230_s30 + $0xb0] sm:$0xff] %vm1137_vm2, %v1099_v16  ;;  %v1102_v20 = vadd.f32 %v1758_v19, %v2226_v40  ;;  %v1093_v21 = vpop.f32.mrb[39].mxu0 }
 0x2d5   : > { %1158 = vst.msk [vmem:[%s2230_s30 + $0xa0] sm:$0xff] %vm1137_vm2, %v1091_v18  ;;  %v1094_v22 = vadd.f32 %v2226_v40, %v1093_v21 }
 0x2d6   : > { %1161 = vst.msk [vmem:[%s2230_s30 + $0xb8] sm:$0xff] %vm1137_vm2, %v1102_v20 }
 0x2d7   : > { %1159 = vst.msk [vmem:[%s2230_s30 + $0xa8] sm:$0xff] %vm1137_vm2, %v1094_v22 }
 0x2d9   : > { %v1761_v23 = vpop.f32.mrb[40].mxu0 }
 0x2da   : > { %v1115_v24 = vadd.f32 %v1761_v23, %v2226_v40  ;;  %v1106_v25 = vpop.f32.mrb[41].mxu0 }
 0x2db   : > { %v1107_v26 = vadd.f32 %v2226_v40, %v1106_v25  ;;  %v1762_v27 = vpop.f32.mrb[42].mxu0 }
 0x2dc   : > { %1164 = vst.msk [vmem:[%s2230_s30 + $0xd0] sm:$0xff] %vm1137_vm2, %v1115_v24  ;;  %v1118_v28 = vadd.f32 %v1762_v27, %v2226_v40  ;;  %v1109_v29 = vpop.f32.mrb[43].mxu0 }
 0x2dd   : > { %1162 = vst.msk [vmem:[%s2230_s30 + $0xc0] sm:$0xff] %vm1137_vm2, %v1107_v26  ;;  %v1110_v30 = vadd.f32 %v2226_v40, %v1109_v29 }
 0x2de   : > { %1165 = vst.msk [vmem:[%s2230_s30 + $0xd8] sm:$0xff] %vm1137_vm2, %v1118_v28 }
 0x2df   : > { %1163 = vst.msk [vmem:[%s2230_s30 + $0xc8] sm:$0xff] %vm1137_vm2, %v1110_v30 }
 0x2e1   : > { %v1765_v31 = vpop.f32.mrb[44].mxu0  ;;  %1176 = sbr.rel (!%p2029_p4) target bundleno = 800 (0x320), region = 52 }
 0x2e2   : > { %v1131_v32 = vadd.f32 %v1765_v31, %v2226_v40  ;;  %v1122_v33 = vpop.f32.mrb[45].mxu0 }
 0x2e3   : > { %v1123_v34 = vadd.f32 %v2226_v40, %v1122_v33  ;;  %v1766_v36 = vpop.f32.mrb[46].mxu0 }
 0x2e4   : > { %1168 = vst.msk [vmem:[%s2230_s30 + $0xf0] sm:$0xff] %vm1137_vm2, %v1131_v32  ;;  %v1134_v37 = vadd.f32 %v1766_v36, %v2226_v40  ;;  %v1125_v39 = vpop.f32.mrb[47].mxu0 }
 0x2e5   : > { %1166 = vst.msk [vmem:[%s2230_s30 + $0xe0] sm:$0xff] %vm1137_vm2, %v1123_v34  ;;  %v1126_v41 = vadd.f32 %v2226_v40, %v1125_v39 }
 0x2e6   : > { %1169 = vst.msk [vmem:[%s2230_s30 + $0xf8] sm:$0xff] %vm1137_vm2, %v1134_v37 }
 0x2e7   : > { %1167 = vst.msk [vmem:[%s2230_s30 + $0xe8] sm:$0xff] %vm1137_vm2, %v1126_v41 }
 0x2e8   : > { %s2483_s24 = smov (!%p1179_p8, %s1178_s24), 32 }
 0x2e9   : > { %s1554_s15 = sshll.u32 %s2483_s24, 7 }
 0x2ea   : > { %p1557_p9 = scmp.eq.s32.totalorder %s1554_s15, 0 }
 0x2eb   : > { %s2339_s16 = sshrl.u32 (!%p1557_p9), %s2483_s24, 5 }
 0x2ec   : > { %1187 = sbr.rel (%p1557_p9) target bundleno = 800 (0x320), region = 56  ;;  %p1558_p10 = scmp.le.s32.totalorder (!%p1557_p9), %s2339_s16, 0 }
 0x2f3   : > { %1465 = sbr.rel (%p1558_p10) target bundleno = 779 (0x30b), region = 132  ;;  %s2474_s27 = smov (!%p1558_p10), %s2333_s14 }
 0x2f4   : > { %s2475_s9 = smov (!%p1558_p10), %s2230_s30  ;;  %s2348_s12 = smov (!%p1558_p10), 0  }
 0x2f5   : > { %s2350_s17 = smov (!%p1558_p10), 0  }
 0x2fa LB: >> { %v1311_v40 = vld [vmem:[%s1938_s9] sm:$0xff]  ;;  %v1313_v42 = vld [vmem:[%s1938_s9 + $0x8] sm:$0xff]  ;;  %v1315_v35 = vld [vmem:[%s1938_s9 + $0x10] sm:$0xff]  ;;  %s1375_s18 = sadd.s32 1, %s1942_s12  ;;  %s1305_s17 = sadd.s32 1, %s1946_s17   ;;  %s1946_s17 = sphi %s2350_s17, %s1305_s17   ;;  %s1942_s12 = sphi %s2348_s12, %s2478_s12   ;;  %s1938_s9 = sphi %s2475_s9, %s2477_s9   ;;  %s1934_s27 = sphi %s2474_s27, %s2476_s27  }
 0x2fb   : >> { %1312 = vst [vmem:[%s1934_s27] sm:$0xff] %v1311_v40  ;;  %1314 = vst [vmem:[%s1934_s27 + $0x8] sm:$0xff] %v1313_v42  ;;  %v1317_v43 = vld [vmem:[%s1938_s9 + $0x18] sm:$0xff]  ;;  %v1319_v44 = vld [vmem:[%s1938_s9 + $0x20] sm:$0xff]  ;;  %p1376_p11 = scmp.ge.s32.totalorder %s1375_s18, %s2339_s16  ;;  %p1304_p12 = scmp.ge.s32.totalorder %s1305_s17, %s2339_s16 }
 0x2fc   : >> { %1316 = vst [vmem:[%s1934_s27 + $0x10] sm:$0xff] %v1315_v35  ;;  %v1321_v45 = vld [vmem:[%s1938_s9 + $0x28] sm:$0xff]  ;;  %1318 = vst [vmem:[%s1934_s27 + $0x18] sm:$0xff] %v1317_v43  ;;  %v1323_v46 = vld [vmem:[%s1938_s9 + $0x30] sm:$0xff] }
 0x2fd   : >> { %1320 = vst [vmem:[%s1934_s27 + $0x20] sm:$0xff] %v1319_v44  ;;  %1322 = vst [vmem:[%s1934_s27 + $0x28] sm:$0xff] %v1321_v45  ;;  %v1325_v47 = vld [vmem:[%s1938_s9 + $0x38] sm:$0xff]  ;;  %v1327_v48 = vld [vmem:[%s1938_s9 + $0x40] sm:$0xff]  ;;  %s2485_s18 = smov (%p1376_p11, %s1375_s18), 0 }
 0x2fe   : >> { %1324 = vst [vmem:[%s1934_s27 + $0x30] sm:$0xff] %v1323_v46  ;;  %1326 = vst [vmem:[%s1934_s27 + $0x38] sm:$0xff] %v1325_v47  ;;  %v1329_v49 = vld [vmem:[%s1938_s9 + $0x48] sm:$0xff]  ;;  %v1331_v50 = vld [vmem:[%s1938_s9 + $0x50] sm:$0xff]  ;;  %s1559_s19 = sshll.u32 %s2485_s18, 8  ;;  %s2478_s12 = smov %s2485_s18 }
 0x2ff   : >> { %1328 = vst [vmem:[%s1934_s27 + $0x40] sm:$0xff] %v1327_v48  ;;  %v1333_v51 = vld [vmem:[%s1938_s9 + $0x58] sm:$0xff]  ;;  %1330 = vst [vmem:[%s1934_s27 + $0x48] sm:$0xff] %v1329_v49  ;;  %v1335_v0 = vld [vmem:[%s1938_s9 + $0x60] sm:$0xff]  ;;  %s2406_s20 = scalar_lea.vmem %s2230_s30, %s1559_s19 [#allocation2]   ;;  %s1381_s21 = scalar_lea.vmem %s2333_s14, %s1559_s19  }
 0x300   : >> { %1332 = vst [vmem:[%s1934_s27 + $0x50] sm:$0xff] %v1331_v50  ;;  %1334 = vst [vmem:[%s1934_s27 + $0x58] sm:$0xff] %v1333_v51  ;;  %v1337_v38 = vld [vmem:[%s1938_s9 + $0x68] sm:$0xff]  ;;  %v1339_v52 = vld [vmem:[%s1938_s9 + $0x70] sm:$0xff] }
 0x301   : >> { %1336 = vst [vmem:[%s1934_s27 + $0x60] sm:$0xff] %v1335_v0  ;;  %1338 = vst [vmem:[%s1934_s27 + $0x68] sm:$0xff] %v1337_v38  ;;  %v1341_v53 = vld [vmem:[%s1938_s9 + $0x78] sm:$0xff]  ;;  %v1343_v54 = vld [vmem:[%s1938_s9 + $0x80] sm:$0xff] }
 0x302   : >> { %1340 = vst [vmem:[%s1934_s27 + $0x70] sm:$0xff] %v1339_v52  ;;  %v1345_v55 = vld [vmem:[%s1938_s9 + $0x88] sm:$0xff]  ;;  %1342 = vst [vmem:[%s1934_s27 + $0x78] sm:$0xff] %v1341_v53  ;;  %v1347_v56 = vld [vmem:[%s1938_s9 + $0x90] sm:$0xff] }
 0x303   : >> { %1344 = vst [vmem:[%s1934_s27 + $0x80] sm:$0xff] %v1343_v54  ;;  %1346 = vst [vmem:[%s1934_s27 + $0x88] sm:$0xff] %v1345_v55  ;;  %v1349_v57 = vld [vmem:[%s1938_s9 + $0x98] sm:$0xff]  ;;  %v1351_v58 = vld [vmem:[%s1938_s9 + $0xa0] sm:$0xff] }
 0x304   : >> { %1348 = vst [vmem:[%s1934_s27 + $0x90] sm:$0xff] %v1347_v56  ;;  %1350 = vst [vmem:[%s1934_s27 + $0x98] sm:$0xff] %v1349_v57  ;;  %v1353_v59 = vld [vmem:[%s1938_s9 + $0xa8] sm:$0xff]  ;;  %v1355_v60 = vld [vmem:[%s1938_s9 + $0xb0] sm:$0xff]  ;;  %1307 = sbr.rel (!%p1304_p12) target bundleno = 762 (0x2fa), region = 138 }
 0x305   : >> { %1352 = vst [vmem:[%s1934_s27 + $0xa0] sm:$0xff] %v1351_v58  ;;  %v1357_v61 = vld [vmem:[%s1938_s9 + $0xb8] sm:$0xff]  ;;  %1354 = vst [vmem:[%s1934_s27 + $0xa8] sm:$0xff] %v1353_v59  ;;  %v1359_v62 = vld [vmem:[%s1938_s9 + $0xc0] sm:$0xff] }
 0x306   : >> { %1356 = vst [vmem:[%s1934_s27 + $0xb0] sm:$0xff] %v1355_v60  ;;  %1358 = vst [vmem:[%s1934_s27 + $0xb8] sm:$0xff] %v1357_v61  ;;  %v1361_v63 = vld [vmem:[%s1938_s9 + $0xc8] sm:$0xff]  ;;  %v1363_v1 = vld [vmem:[%s1938_s9 + $0xd0] sm:$0xff] }
 0x307   : >> { %1360 = vst [vmem:[%s1934_s27 + $0xc0] sm:$0xff] %v1359_v62  ;;  %1362 = vst [vmem:[%s1934_s27 + $0xc8] sm:$0xff] %v1361_v63  ;;  %v1365_v2 = vld [vmem:[%s1938_s9 + $0xd8] sm:$0xff]  ;;  %v1367_v3 = vld [vmem:[%s1938_s9 + $0xe0] sm:$0xff] }
 0x308   : >> { %1364 = vst [vmem:[%s1934_s27 + $0xd0] sm:$0xff] %v1363_v1  ;;  %v1369_v4 = vld [vmem:[%s1938_s9 + $0xe8] sm:$0xff]  ;;  %1366 = vst [vmem:[%s1934_s27 + $0xd8] sm:$0xff] %v1365_v2  ;;  %v1371_v5 = vld [vmem:[%s1938_s9 + $0xf0] sm:$0xff] }
 0x309   : >> { %1368 = vst [vmem:[%s1934_s27 + $0xe0] sm:$0xff] %v1367_v3  ;;  %1370 = vst [vmem:[%s1934_s27 + $0xe8] sm:$0xff] %v1369_v4  ;;  %v1373_v6 = vld [vmem:[%s1938_s9 + $0xf8] sm:$0xff]  ;;  %s2477_s9 = smov %s2406_s20 }
 0x30a   : >> { %1372 = vst [vmem:[%s1934_s27 + $0xf0] sm:$0xff] %v1371_v5  ;;  %1374 = vst [vmem:[%s1934_s27 + $0xf8] sm:$0xff] %v1373_v6  ;;  %s2476_s27 = smov %s1381_s21 }
 0x30b PF: > { %s2447_s22 = sand.u32 31, %s2483_s24   ;;  %s1570_s23 = sshll.u32 %s2339_s16, 8 }
 0x30c   : > { %s1386_s26 = scalar_lea.vmem %s2230_s30, %s1570_s23 [#allocation2]   ;;  %s1388_s29 = scalar_lea.vmem %s2333_s14, %s1570_s23  }
 0x30d   : > { %p1564_p13 = scmp.le.s32.totalorder %s2447_s22, 0 }
 0x30e   : > { %s1948_s10 = smov (!%p1564_p13), %s1388_s29   ;;  %s1952_s11 = smov (!%p1564_p13), %s1386_s26  }
 0x30f   : > { %1479 = sbr.rel (%p1564_p13) target bundleno = 800 (0x320), region = 143  ;;  %s1956_s13 = smov (!%p1564_p13), 0  }
 0x310   : > { %s1960_s15 = smov (!%p1564_p13), 0  }
 0x316 LB: >> { %v1398_v7 = vld [vmem:[%s1954_s11] sm:$0xff]  ;;  %s1400_s24 = sadd.s32 1, %s1958_s13  ;;  %s1392_s15 = sadd.s32 1, %s1962_s15   ;;  %s1962_s15 = sphi %s1960_s15, %s1392_s15   ;;  %s1958_s13 = sphi %s1956_s13, %s1957_s13   ;;  %s1954_s11 = sphi %s1952_s11, %s1405_s11   ;;  %s1950_s10 = sphi %s1948_s10, %s1406_s10  }
 0x317   : >> { %1399 = vst [vmem:[%s1950_s10] sm:$0xff] %v1398_v7  ;;  %p1401_p0 = scmp.ge.s32.totalorder %s1400_s24, %s2447_s22  ;;  %p1391_p1 = scmp.ge.s32.totalorder %s1392_s15, %s2447_s22 }
 0x319   : >> { %s2487_s24 = smov (%p1401_p0, %s1400_s24), 0  ;;  %1394 = sbr.rel (!%p1391_p1) target bundleno = 790 (0x316), region = 149 }
 0x31a   : >> { %s1565_s30 = sshll.u32 %s2487_s24, 3  ;;  %s1957_s13 = smov %s2487_s24  }
 0x31b   : >> { %s1405_s11 = scalar_lea.vmem %s1386_s26, %s1565_s30 [#allocation2]   ;;  %s1406_s10 = scalar_lea.vmem %s1388_s29, %s1565_s30  }
 0x320 PF: > { %p14_p2 = scmp.ge.s32.totalorder %s2019_s28, 4   ;;  %s2479_s24 = smov %s1926_s25 }
 0x321   : > { %s2480_s25 = smov %s2027_s8  ;;  %s2481_s26 = smov %s2019_s28 }
 0x322   :  { %16 = sbr.rel (!%p14_p2) target bundleno = 2 (0x2), region = 160 }

</bundles_post_ra>
